<compile_context>
chip_gen: v6e
topology: v6e:2x2x1
jax: 0.10.0
libtpu: 0.0.40
codegen_flags: <defaults>
</compile_context>

<pallas_src>
import jax
import jax.numpy as jnp
from jax import lax
from jax.experimental import pallas as pl
from jax.experimental.pallas import tpu as pltpu


_LANES = 128   # pad V / D / F / O up to this for lane-dense matmuls & stores


def encoder_kernel(ids_ref,          # VMEM [TB, S]   int32  (this batch block's ids)
                   emb_ref,          # VMEM [Vp, Dp]  f32    (resident table, const index)
                   w1_ref, b1_ref,   # VMEM [Dp, Fp] bf16, [1, Fp] f32
                   w2_ref, b2_ref,   # VMEM [Fp, Op] bf16, [1, Op] f32
                   out_ref):         # VMEM [TB, Op]  f32   (lane-dense)
    TB, S = ids_ref.shape
    Vp = emb_ref.shape[0]

    ids = ids_ref[...]                                            # [TB, S] int32

    # ---- EmbeddingBag(mode='mean', padding_idx=0) as one MXU matmul -----------
    # Build the count-weighted one-hot bag matrix A (padding id 0 excluded).
    vocab = lax.broadcasted_iota(jnp.int32, (TB, Vp), 1)          # [TB, Vp]
    A = jnp.zeros((TB, Vp), jnp.float32)
    # S is static and small here; for long sequences switch to lax.fori_loop.
    for s in range(S):
        tok = ids[:, s:s + 1]                                     # [TB, 1]
        hit = (vocab == tok) & (tok != 0)                         # [TB, Vp] bool
        A = A + jnp.where(hit, 1.0, 0.0)

    counts = jnp.sum(jnp.where(ids != 0, 1.0, 0.0), axis=1, keepdims=True)  # [TB, 1]
    inv = 1.0 / jnp.maximum(counts, 1.0)                          # empty bag -> 0 output
    A = A * inv                                                   # [TB, Vp]

    # f32 MXU matmul: gather + masked mean in one shot (padded rows/cols are 0).
    bag_mean = jnp.dot(A, emb_ref[...], preferred_element_type=jnp.float32)  # [TB, Dp]

    # ---- Dropout (eval mode -> identity) ---------------------------------------

    # ---- Linear -> ReLU -> Linear (bf16 MXU operands, f32 accumulation) --------
    h = jnp.dot(bag_mean.astype(w1_ref.dtype), w1_ref[...],
                preferred_element_type=jnp.float32) + b1_ref[...]             # [TB, Fp]
    h = jnp.maximum(h, 0.0)
    out = jnp.dot(h.astype(w2_ref.dtype), w2_ref[...],
                  preferred_element_type=jnp.float32) + b2_ref[...]           # [TB, Op]
    out_ref[...] = out


def _round_up(x, m):
    return ((x + m - 1) // m) * m


def regularized_simple_text_encoder(ids, emb, w1, b1, w2, b2):
    B, S = ids.shape
    V, D = emb.shape
    F = w1.shape[1]
    O = w2.shape[1]

    Vp = _round_up(V, _LANES)
    Dp = _round_up(D, _LANES)
    Fp = _round_up(F, _LANES)
    Op = _round_up(O, _LANES)

    # Zero-padded, lane-dense operands. Table stays f32 (exact bag mean);
    # MLP weights are bf16 (MXU-native), biases f32.
    emb_p = jnp.zeros((Vp, Dp), jnp.float32).at[:V, :D].set(emb.astype(jnp.float32))
    w1_p = jnp.zeros((Dp, Fp), jnp.bfloat16).at[:D, :F].set(w1.astype(jnp.bfloat16))
    b1_p = jnp.zeros((1, Fp), jnp.float32).at[:, :F].set(b1.reshape(1, F).astype(jnp.float32))
    w2_p = jnp.zeros((Fp, Op), jnp.bfloat16).at[:F, :O].set(w2.astype(jnp.bfloat16))
    b2_p = jnp.zeros((1, Op), jnp.float32).at[:, :O].set(b2.reshape(1, O).astype(jnp.float32))

    # Batch blocking: aim for >= 2 grid steps when B allows (v7x has 2 TCs);
    # padded bags are all-padding and get sliced off below.
    TB = min(_round_up(pl.cdiv(B, 2), 8), 128)
    Bp = _round_up(B, TB)
    ids_p = jnp.zeros((Bp, S), jnp.int32).at[:B].set(ids.astype(jnp.int32))

    out = pl.pallas_call(
        encoder_kernel,
        out_shape=jax.ShapeDtypeStruct((Bp, Op), jnp.float32),
        grid_spec=pltpu.PrefetchScalarGridSpec(
            num_scalar_prefetch=0,
            grid=(Bp // TB,),
            in_specs=[
                pl.BlockSpec((TB, S), lambda i: (i, 0)),     # ids (per-block)
                pl.BlockSpec((Vp, Dp), lambda i: (0, 0)),    # emb table, VMEM-resident
                pl.BlockSpec((Dp, Fp), lambda i: (0, 0)),    # w1 (constant index)
                pl.BlockSpec((1, Fp), lambda i: (0, 0)),     # b1
                pl.BlockSpec((Fp, Op), lambda i: (0, 0)),    # w2
                pl.BlockSpec((1, Op), lambda i: (0, 0)),     # b2
            ],
            out_specs=pl.BlockSpec((TB, Op), lambda i: (i, 0)),
        ),
        compiler_params=pltpu.CompilerParams(
            dimension_semantics=("parallel",),       # batch blocks across TCs (v7x)
            vmem_limit_bytes=32 * 1024 * 1024,       # explicit budget, v7x-safe
        ),
    )(ids_p, emb_p, w1_p, b1_p, w2_p, b2_p)

    return out[:B, :O]


def init_params(key, num_embeddings, embedding_dim, fc_dim, output_dim):
    k_emb, k_w1, k_b1, k_w2, k_b2 = jax.random.split(key, 5)
    emb = jax.random.normal(k_emb, (num_embeddings, embedding_dim), jnp.float32) * 0.1
    # padding_idx=0 -> embedding row 0 is zeros (like PyTorch init)
    emb = emb.at[0].set(0.0)
    w1 = jax.random.normal(k_w1, (embedding_dim, fc_dim), jnp.float32) * 0.1
    b1 = jax.random.normal(k_b1, (1, fc_dim), jnp.float32) * 0.1
    w2 = jax.random.normal(k_w2, (fc_dim, output_dim), jnp.float32) * 0.1
    b2 = jax.random.normal(k_b2, (1, output_dim), jnp.float32) * 0.1
    return emb, w1, b1, w2, b2


if __name__ == "__main__":
    num_embeddings = 64   # vocab size
    embedding_dim = 32
    fc_dim = 64
    output_dim = 16
    batch = 8
    seq = 8

    key = jax.random.PRNGKey(0)
    k_params, k_ids = jax.random.split(key)
    emb, w1, b1, w2, b2 = init_params(
        k_params, num_embeddings, embedding_dim, fc_dim, output_dim)

    # token ids in [0, V); id 0 acts as padding and is excluded from the mean
    ids = jax.random.randint(k_ids, (batch, seq), 0, num_embeddings, jnp.int32)

    out = regularized_simple_text_encoder(ids, emb, w1, b1, w2, b2)
    jax.block_until_ready(out)

    # reference in plain JAX (MLP weights bf16-rounded to match the kernel's MXU dtypes)
    w1_r = w1.astype(jnp.bfloat16).astype(jnp.float32)
    w2_r = w2.astype(jnp.bfloat16).astype(jnp.float32)
    nonpad = (ids != 0).astype(jnp.float32)
    counts = jnp.maximum(nonpad.sum(axis=1, keepdims=True), 1.0)
    bag = (emb[ids] * nonpad[:, :, None]).sum(axis=1) / counts
    ref = jnp.maximum(bag @ w1_r + b1, 0.0) @ w2_r + b2

    assert out.shape == (batch, output_dim)
    assert jnp.allclose(out, ref, atol=2e-2, rtol=2e-2), (
        "max abs err = %f" % float(jnp.max(jnp.abs(out - ref))))

    print("KERNEL_OK")
</pallas_src>

<mosaic_0001>
module attributes {stable_mosaic.version = 11 : i64} {
  func.func @encoder_kernel(%arg0: i32, %arg1: memref<8x8xi32, #tpu.memory_space<vmem>>, %arg2: memref<128x128xf32, #tpu.memory_space<vmem>>, %arg3: memref<128x128xbf16, #tpu.memory_space<vmem>>, %arg4: memref<1x128xf32, #tpu.memory_space<vmem>>, %arg5: memref<128x128xbf16, #tpu.memory_space<vmem>>, %arg6: memref<1x128xf32, #tpu.memory_space<vmem>>, %arg7: memref<8x128xf32, #tpu.memory_space<vmem>>) attributes {dimension_semantics = [#tpu.dimension_semantics<parallel>], iteration_bounds = array<i64: 1>, scalar_prefetch = 0 : i64, scratch_operands = 0 : i64, tpu.core_type = #tpu.core_type<tc>, window_params = [{transform_indices = @transform_0, window_bounds = array<i64: 8, 8>}, {pipeline_mode = #tpu.pipeline_mode<synchronous>, transform_indices = @transform_1, window_bounds = array<i64: 128, 128>}, {pipeline_mode = #tpu.pipeline_mode<synchronous>, transform_indices = @transform_2, window_bounds = array<i64: 128, 128>}, {pipeline_mode = #tpu.pipeline_mode<synchronous>, transform_indices = @transform_3, window_bounds = array<i64: 1, 128>}, {pipeline_mode = #tpu.pipeline_mode<synchronous>, transform_indices = @transform_4, window_bounds = array<i64: 128, 128>}, {pipeline_mode = #tpu.pipeline_mode<synchronous>, transform_indices = @transform_5, window_bounds = array<i64: 1, 128>}, {transform_indices = @transform_6, window_bounds = array<i64: 8, 128>}]} {
    %c0 = arith.constant 0 : index
    %c0_0 = arith.constant 0 : index
    %0 = vector.load %arg1[%c0, %c0_0] : memref<8x8xi32, #tpu.memory_space<vmem>>, vector<8x8xi32>
    %1 = tpu.iota {dimensions = array<i32: 1>} : vector<8x128xi32>
    %cst = arith.constant 0.000000e+00 : f32
    %2 = vector.broadcast %cst : f32 to vector<8x128xf32>
    %3 = vector.extract_strided_slice %0 {offsets = [0, 0], sizes = [8, 1], strides = [1, 1]} : vector<8x8xi32> to vector<8x1xi32>
    %4 = vector.broadcast %3 : vector<8x1xi32> to vector<8x128xi32>
    %5 = arith.cmpi eq, %1, %4 : vector<8x128xi32>
    %c0_i32 = arith.constant 0 : i32
    %6 = vector.broadcast %c0_i32 : i32 to vector<8x1xi32>
    %7 = arith.cmpi ne, %3, %6 : vector<8x1xi32>
    %8 = vector.broadcast %7 : vector<8x1xi1> to vector<8x128xi1>
    %9 = arith.andi %5, %8 : vector<8x128xi1>
    %cst_1 = arith.constant 1.000000e+00 : f32
    %cst_2 = arith.constant 0.000000e+00 : f32
    %10 = vector.broadcast %cst_1 : f32 to vector<8x128xf32>
    %11 = vector.broadcast %cst_2 : f32 to vector<8x128xf32>
    %12 = arith.select %9, %10, %11 : vector<8x128xi1>, vector<8x128xf32>
    %13 = arith.addf %2, %12 : vector<8x128xf32>
    %14 = vector.extract_strided_slice %0 {offsets = [0, 1], sizes = [8, 1], strides = [1, 1]} : vector<8x8xi32> to vector<8x1xi32>
    %15 = vector.broadcast %14 : vector<8x1xi32> to vector<8x128xi32>
    %16 = arith.cmpi eq, %1, %15 : vector<8x128xi32>
    %c0_i32_3 = arith.constant 0 : i32
    %17 = vector.broadcast %c0_i32_3 : i32 to vector<8x1xi32>
    %18 = arith.cmpi ne, %14, %17 : vector<8x1xi32>
    %19 = vector.broadcast %18 : vector<8x1xi1> to vector<8x128xi1>
    %20 = arith.andi %16, %19 : vector<8x128xi1>
    %cst_4 = arith.constant 1.000000e+00 : f32
    %cst_5 = arith.constant 0.000000e+00 : f32
    %21 = vector.broadcast %cst_4 : f32 to vector<8x128xf32>
    %22 = vector.broadcast %cst_5 : f32 to vector<8x128xf32>
    %23 = arith.select %20, %21, %22 : vector<8x128xi1>, vector<8x128xf32>
    %24 = arith.addf %13, %23 : vector<8x128xf32>
    %25 = vector.extract_strided_slice %0 {offsets = [0, 2], sizes = [8, 1], strides = [1, 1]} : vector<8x8xi32> to vector<8x1xi32>
    %26 = vector.broadcast %25 : vector<8x1xi32> to vector<8x128xi32>
    %27 = arith.cmpi eq, %1, %26 : vector<8x128xi32>
    %c0_i32_6 = arith.constant 0 : i32
    %28 = vector.broadcast %c0_i32_6 : i32 to vector<8x1xi32>
    %29 = arith.cmpi ne, %25, %28 : vector<8x1xi32>
    %30 = vector.broadcast %29 : vector<8x1xi1> to vector<8x128xi1>
    %31 = arith.andi %27, %30 : vector<8x128xi1>
    %cst_7 = arith.constant 1.000000e+00 : f32
    %cst_8 = arith.constant 0.000000e+00 : f32
    %32 = vector.broadcast %cst_7 : f32 to vector<8x128xf32>
    %33 = vector.broadcast %cst_8 : f32 to vector<8x128xf32>
    %34 = arith.select %31, %32, %33 : vector<8x128xi1>, vector<8x128xf32>
    %35 = arith.addf %24, %34 : vector<8x128xf32>
    %36 = vector.extract_strided_slice %0 {offsets = [0, 3], sizes = [8, 1], strides = [1, 1]} : vector<8x8xi32> to vector<8x1xi32>
    %37 = vector.broadcast %36 : vector<8x1xi32> to vector<8x128xi32>
    %38 = arith.cmpi eq, %1, %37 : vector<8x128xi32>
    %c0_i32_9 = arith.constant 0 : i32
    %39 = vector.broadcast %c0_i32_9 : i32 to vector<8x1xi32>
    %40 = arith.cmpi ne, %36, %39 : vector<8x1xi32>
    %41 = vector.broadcast %40 : vector<8x1xi1> to vector<8x128xi1>
    %42 = arith.andi %38, %41 : vector<8x128xi1>
    %cst_10 = arith.constant 1.000000e+00 : f32
    %cst_11 = arith.constant 0.000000e+00 : f32
    %43 = vector.broadcast %cst_10 : f32 to vector<8x128xf32>
    %44 = vector.broadcast %cst_11 : f32 to vector<8x128xf32>
    %45 = arith.select %42, %43, %44 : vector<8x128xi1>, vector<8x128xf32>
    %46 = arith.addf %35, %45 : vector<8x128xf32>
    %47 = vector.extract_strided_slice %0 {offsets = [0, 4], sizes = [8, 1], strides = [1, 1]} : vector<8x8xi32> to vector<8x1xi32>
    %48 = vector.broadcast %47 : vector<8x1xi32> to vector<8x128xi32>
    %49 = arith.cmpi eq, %1, %48 : vector<8x128xi32>
    %c0_i32_12 = arith.constant 0 : i32
    %50 = vector.broadcast %c0_i32_12 : i32 to vector<8x1xi32>
    %51 = arith.cmpi ne, %47, %50 : vector<8x1xi32>
    %52 = vector.broadcast %51 : vector<8x1xi1> to vector<8x128xi1>
    %53 = arith.andi %49, %52 : vector<8x128xi1>
    %cst_13 = arith.constant 1.000000e+00 : f32
    %cst_14 = arith.constant 0.000000e+00 : f32
    %54 = vector.broadcast %cst_13 : f32 to vector<8x128xf32>
    %55 = vector.broadcast %cst_14 : f32 to vector<8x128xf32>
    %56 = arith.select %53, %54, %55 : vector<8x128xi1>, vector<8x128xf32>
    %57 = arith.addf %46, %56 : vector<8x128xf32>
    %58 = vector.extract_strided_slice %0 {offsets = [0, 5], sizes = [8, 1], strides = [1, 1]} : vector<8x8xi32> to vector<8x1xi32>
    %59 = vector.broadcast %58 : vector<8x1xi32> to vector<8x128xi32>
    %60 = arith.cmpi eq, %1, %59 : vector<8x128xi32>
    %c0_i32_15 = arith.constant 0 : i32
    %61 = vector.broadcast %c0_i32_15 : i32 to vector<8x1xi32>
    %62 = arith.cmpi ne, %58, %61 : vector<8x1xi32>
    %63 = vector.broadcast %62 : vector<8x1xi1> to vector<8x128xi1>
    %64 = arith.andi %60, %63 : vector<8x128xi1>
    %cst_16 = arith.constant 1.000000e+00 : f32
    %cst_17 = arith.constant 0.000000e+00 : f32
    %65 = vector.broadcast %cst_16 : f32 to vector<8x128xf32>
    %66 = vector.broadcast %cst_17 : f32 to vector<8x128xf32>
    %67 = arith.select %64, %65, %66 : vector<8x128xi1>, vector<8x128xf32>
    %68 = arith.addf %57, %67 : vector<8x128xf32>
    %69 = vector.extract_strided_slice %0 {offsets = [0, 6], sizes = [8, 1], strides = [1, 1]} : vector<8x8xi32> to vector<8x1xi32>
    %70 = vector.broadcast %69 : vector<8x1xi32> to vector<8x128xi32>
    %71 = arith.cmpi eq, %1, %70 : vector<8x128xi32>
    %c0_i32_18 = arith.constant 0 : i32
    %72 = vector.broadcast %c0_i32_18 : i32 to vector<8x1xi32>
    %73 = arith.cmpi ne, %69, %72 : vector<8x1xi32>
    %74 = vector.broadcast %73 : vector<8x1xi1> to vector<8x128xi1>
    %75 = arith.andi %71, %74 : vector<8x128xi1>
    %cst_19 = arith.constant 1.000000e+00 : f32
    %cst_20 = arith.constant 0.000000e+00 : f32
    %76 = vector.broadcast %cst_19 : f32 to vector<8x128xf32>
    %77 = vector.broadcast %cst_20 : f32 to vector<8x128xf32>
    %78 = arith.select %75, %76, %77 : vector<8x128xi1>, vector<8x128xf32>
    %79 = arith.addf %68, %78 : vector<8x128xf32>
    %80 = vector.extract_strided_slice %0 {offsets = [0, 7], sizes = [8, 1], strides = [1, 1]} : vector<8x8xi32> to vector<8x1xi32>
    %81 = vector.broadcast %80 : vector<8x1xi32> to vector<8x128xi32>
    %82 = arith.cmpi eq, %1, %81 : vector<8x128xi32>
    %c0_i32_21 = arith.constant 0 : i32
    %83 = vector.broadcast %c0_i32_21 : i32 to vector<8x1xi32>
    %84 = arith.cmpi ne, %80, %83 : vector<8x1xi32>
    %85 = vector.broadcast %84 : vector<8x1xi1> to vector<8x128xi1>
    %86 = arith.andi %82, %85 : vector<8x128xi1>
    %cst_22 = arith.constant 1.000000e+00 : f32
    %cst_23 = arith.constant 0.000000e+00 : f32
    %87 = vector.broadcast %cst_22 : f32 to vector<8x128xf32>
    %88 = vector.broadcast %cst_23 : f32 to vector<8x128xf32>
    %89 = arith.select %86, %87, %88 : vector<8x128xi1>, vector<8x128xf32>
    %90 = arith.addf %79, %89 : vector<8x128xf32>
    %c0_i32_24 = arith.constant 0 : i32
    %91 = vector.broadcast %c0_i32_24 : i32 to vector<8x8xi32>
    %92 = arith.cmpi ne, %0, %91 : vector<8x8xi32>
    %cst_25 = arith.constant 1.000000e+00 : f32
    %cst_26 = arith.constant 0.000000e+00 : f32
    %93 = vector.broadcast %cst_25 : f32 to vector<8x8xf32>
    %94 = vector.broadcast %cst_26 : f32 to vector<8x8xf32>
    %95 = arith.select %92, %93, %94 : vector<8x8xi1>, vector<8x8xf32>
    %cst_27 = arith.constant dense<0.000000e+00> : vector<8xf32>
    %96 = vector.multi_reduction <add>, %95, %cst_27 [1] : vector<8x8xf32> to vector<8xf32>
    %97 = vector.shape_cast %96 : vector<8xf32> to vector<8x1xf32>
    %cst_28 = arith.constant 1.000000e+00 : f32
    %98 = vector.broadcast %cst_28 : f32 to vector<8x1xf32>
    %99 = arith.maximumf %97, %98 : vector<8x1xf32>
    %cst_29 = arith.constant 1.000000e+00 : f32
    %100 = vector.broadcast %cst_29 : f32 to vector<8x1xf32>
    %101 = arith.divf %100, %99 : vector<8x1xf32>
    %102 = vector.broadcast %101 : vector<8x1xf32> to vector<8x128xf32>
    %103 = arith.mulf %90, %102 : vector<8x128xf32>
    %c0_30 = arith.constant 0 : index
    %c0_31 = arith.constant 0 : index
    %104 = vector.load %arg2[%c0_30, %c0_31] : memref<128x128xf32, #tpu.memory_space<vmem>>, vector<128x128xf32>
    %cst_32 = arith.constant dense<0.000000e+00> : vector<8x128xf32>
    %105 = tpu.matmul %103, %104, %cst_32 {dimension_numbers = #tpu.dot_dimension_numbers<[1], [0], [0], [1], [0, 0, 1, 1], [], []>} : vector<8x128xf32>, vector<128x128xf32>, vector<8x128xf32> -> vector<8x128xf32>
    %106 = arith.truncf %105 : vector<8x128xf32> to vector<8x128xbf16>
    %c0_33 = arith.constant 0 : index
    %c0_34 = arith.constant 0 : index
    %107 = vector.load %arg3[%c0_33, %c0_34] : memref<128x128xbf16, #tpu.memory_space<vmem>>, vector<128x128xbf16>
    %cst_35 = arith.constant dense<0.000000e+00> : vector<8x128xf32>
    %108 = tpu.matmul %106, %107, %cst_35 {dimension_numbers = #tpu.dot_dimension_numbers<[1], [0], [0], [1], [0, 0, 1, 1], [], []>} : vector<8x128xbf16>, vector<128x128xbf16>, vector<8x128xf32> -> vector<8x128xf32>
    %c0_36 = arith.constant 0 : index
    %c0_37 = arith.constant 0 : index
    %109 = vector.load %arg4[%c0_36, %c0_37] : memref<1x128xf32, #tpu.memory_space<vmem>>, vector<1x128xf32>
    %110 = vector.broadcast %109 : vector<1x128xf32> to vector<8x128xf32>
    %111 = arith.addf %108, %110 : vector<8x128xf32>
    %cst_38 = arith.constant 0.000000e+00 : f32
    %112 = vector.broadcast %cst_38 : f32 to vector<8x128xf32>
    %113 = arith.maximumf %111, %112 : vector<8x128xf32>
    %114 = arith.truncf %113 : vector<8x128xf32> to vector<8x128xbf16>
    %c0_39 = arith.constant 0 : index
    %c0_40 = arith.constant 0 : index
    %115 = vector.load %arg5[%c0_39, %c0_40] : memref<128x128xbf16, #tpu.memory_space<vmem>>, vector<128x128xbf16>
    %cst_41 = arith.constant dense<0.000000e+00> : vector<8x128xf32>
    %116 = tpu.matmul %114, %115, %cst_41 {dimension_numbers = #tpu.dot_dimension_numbers<[1], [0], [0], [1], [0, 0, 1, 1], [], []>} : vector<8x128xbf16>, vector<128x128xbf16>, vector<8x128xf32> -> vector<8x128xf32>
    %c0_42 = arith.constant 0 : index
    %c0_43 = arith.constant 0 : index
    %117 = vector.load %arg6[%c0_42, %c0_43] : memref<1x128xf32, #tpu.memory_space<vmem>>, vector<1x128xf32>
    %118 = vector.broadcast %117 : vector<1x128xf32> to vector<8x128xf32>
    %119 = arith.addf %116, %118 : vector<8x128xf32>
    %c0_44 = arith.constant 0 : index
    %c0_45 = arith.constant 0 : index
    %120 = vector.load %arg7[%c0_44, %c0_45] : memref<8x128xf32, #tpu.memory_space<vmem>>, vector<8x128xf32>
    tpu.vector_store %arg7[%c0_44, %c0_45], %119 {strides = array<i32>} : memref<8x128xf32, #tpu.memory_space<vmem>>, vector<8x128xf32>,
    return
  }
  func.func @transform_0(%arg0: i32) -> (i32, i32) {
    %c0_i32 = arith.constant 0 : i32
    %c0_i32_0 = arith.constant 0 : i32
    return %arg0, %c0_i32 : i32, i32
  }
  func.func @transform_1(%arg0: i32) -> (i32, i32) {
    %c0_i32 = arith.constant 0 : i32
    %c0_i32_0 = arith.constant 0 : i32
    %c0_i32_1 = arith.constant 0 : i32
    return %c0_i32, %c0_i32_0 : i32, i32
  }
  func.func @transform_2(%arg0: i32) -> (i32, i32) {
    %c0_i32 = arith.constant 0 : i32
    %c0_i32_0 = arith.constant 0 : i32
    %c0_i32_1 = arith.constant 0 : i32
    return %c0_i32, %c0_i32_0 : i32, i32
  }
  func.func @transform_3(%arg0: i32) -> (i32, i32) {
    %c0_i32 = arith.constant 0 : i32
    %c0_i32_0 = arith.constant 0 : i32
    %c0_i32_1 = arith.constant 0 : i32
    return %c0_i32, %c0_i32_0 : i32, i32
  }
  func.func @transform_4(%arg0: i32) -> (i32, i32) {
    %c0_i32 = arith.constant 0 : i32
    %c0_i32_0 = arith.constant 0 : i32
    %c0_i32_1 = arith.constant 0 : i32
    return %c0_i32, %c0_i32_0 : i32, i32
  }
  func.func @transform_5(%arg0: i32) -> (i32, i32) {
    %c0_i32 = arith.constant 0 : i32
    %c0_i32_0 = arith.constant 0 : i32
    %c0_i32_1 = arith.constant 0 : i32
    return %c0_i32, %c0_i32_0 : i32, i32
  }
  func.func @transform_6(%arg0: i32) -> (i32, i32) {
    %c0_i32 = arith.constant 0 : i32
    %c0_i32_0 = arith.constant 0 : i32
    return %arg0, %c0_i32 : i32, i32
  }
}

</mosaic_0001>

<bundles_post_ra>
// kernel: tpu_custom_call.1
= control target key start
LH: loop header
LB: loop body
LE: loop exit
PB: predicated region body
PF: predicated region fallthrough
CT: control target
= control target key end

     0   :  { %11 = vsyncpa [#allocation3], 0  ;;  %s936_s0 = inlined_call_operand.hbm [shape: s32[8,8], index: 0, kind: input, shape index: {}]   ;;  %s937_s1 = inlined_call_operand.hbm [shape: f32[128,128], index: 1, kind: input, shape index: {}]   ;;  %s938_s2 = inlined_call_operand.hbm [shape: bf16[128,128], index: 2, kind: input, shape index: {}]   ;;  %s939_s3 = inlined_call_operand.vmem [shape: f32[1,128], index: 3, kind: input, shape index: {}]   ;;  %s940_s4 = inlined_call_operand.hbm [shape: bf16[128,128], index: 4, kind: input, shape index: {}]   ;;  %s941_s5 = inlined_call_operand.vmem [shape: f32[1,128], index: 5, kind: input, shape index: {}]   ;;  %s942_s6 = inlined_call_operand.hbm [shape: f32[8,128], index: 6, kind: output, shape index: {}]  }
   0x1   :  { %12 = vsyncpa [#allocation6], 0 }
   0x2   :  { %13 = vsyncpa [#allocation9], 0 }
   0x3   :  { %14 = vsyncpa [#allocation4], 0  ;;  %s793_s21 = smov [#allocation5]  }
   0x4   :  { %s30_s22 = sshll.u32 %s793_s21, 4  ;;  %s31_s22 = int_to_ptr.vmem [resolvable:$true] %s30_s22 }
   0x5   :  { %s693_s23 = scalar_lea.vmem %s31_s22, 2048  ;;  %p698_p1 = scmp.lt.s32.totalorder %s31_s22, %s31_s22 }
   0x6   :  { %p694_p0 = scmp.ne.s32.totalorder %s31_s22, %s693_s23  ;;  %p699_p2 = scmp.lt.s32.totalorder %s693_s23, %s693_s23 }
   0x8   :  { %p700_p3 = por %p699_p2, %p698_p1 }
   0xa   :  { %p701_p4 = pnand %p700_p3, %p694_p0 }
   0xc   :  { %704 = shalt.err (!%p701_p4)
}
   0xd   :  { %s794_s24 = smov 128   ;;  %s795_s25 = smov 8  }
   0xe   :  { %36 = dma.hbm_to_vmem [thread:$0]  %s937_s1, 2048, %s31_s22, [#allocation6], %s794_s24, %s794_s24, %s795_s25  }
   0xf   :  { %s796_s28 = smov [#allocation2]   ;;  %s797_s30 = smov [#allocation7]  }
  0x10   :  { %s21_s29 = sshll.u32 %s796_s28, 4  ;;  %s42_s7 = sshll.u32 %s797_s30, 4  ;;  %s22_s29 = int_to_ptr.vmem [resolvable:$true] %s21_s29  ;;  %s43_s7 = int_to_ptr.vmem [resolvable:$true] %s42_s7 }
  0x11   :  { %s713_s8 = scalar_lea.vmem %s22_s29, 128  ;;  %p718_p6 = scmp.lt.s32.totalorder %s22_s29, %s22_s29 }
  0x12   :  { %p714_p5 = scmp.ne.s32.totalorder %s22_s29, %s713_s8  ;;  %p719_p7 = scmp.lt.s32.totalorder %s713_s8, %s713_s8 }
  0x14   :  { %p720_p8 = por %p719_p7, %p718_p6 }
  0x16   :  { %p721_p9 = pnand %p720_p8, %p714_p5 }
  0x18   :  { %724 = shalt.err (!%p721_p9)
}
  0x19   :  { %24 = dma.hbm_to_vmem [thread:$0]  %s936_s0, 128, %s22_s29, [#allocation3]  }
  0x1a   :  { %s733_s11 = scalar_lea.vmem %s43_s7, 1024  ;;  %p738_p11 = scmp.lt.s32.totalorder %s43_s7, %s43_s7 }
  0x1b   :  { %p734_p10 = scmp.ne.s32.totalorder %s43_s7, %s733_s11  ;;  %p739_p12 = scmp.lt.s32.totalorder %s733_s11, %s733_s11 }
  0x1d   :  { %p740_p13 = por %p739_p12, %p738_p11 }
  0x1f   :  { %p741_p0 = pnand %p740_p13, %p734_p10 }
  0x21   :  { %744 = shalt.err (!%p741_p0)
}
  0x22   :  { %s798_s1 = smov 64   ;;  %s799_s12 = smov 4  }
  0x23   :  { %48 = dma.hbm_to_vmem [thread:$0]  %s938_s2, 1024, %s43_s7, [#allocation6], %s798_s1, %s798_s1, %s799_s12  }
  0x24   :  { %s800_s15 = smov [#allocation8]  }
  0x25   :  { %s56_s16 = sshll.u32 %s800_s15, 4  ;;  %s57_s16 = int_to_ptr.vmem [resolvable:$true] %s56_s16 }
  0x26   :  { %s753_s17 = scalar_lea.vmem %s57_s16, 1024  ;;  %p758_p2 = scmp.lt.s32.totalorder %s57_s16, %s57_s16 }
  0x27   :  { %p754_p1 = scmp.ne.s32.totalorder %s57_s16, %s753_s17  ;;  %p759_p3 = scmp.lt.s32.totalorder %s753_s17, %s753_s17 }
  0x29   :  { %p760_p4 = por %p759_p3, %p758_p2 }
  0x2b   :  { %p761_p5 = pnand %p760_p4, %p754_p1 }
  0x2d   :  { %764 = shalt.err (!%p761_p5)
}
  0x2e   :  { %62 = dma.hbm_to_vmem [thread:$0]  %s940_s4, 1024, %s57_s16, [#allocation9], %s798_s1, %s798_s1, %s799_s12  }
  0x2f   :  { %785 = dma.done.wait [#allocation3], 128  }
  0x30   :  { %786 = vsyncadd [#allocation3], 4294967168 }
  0x31   :  { %787 = dma.done.wait [#allocation6], 3072  }
  0x32   :  { %788 = vsyncadd [#allocation6], 4294964224 }
  0x33   :  { %789 = dma.done.wait [#allocation9], 1024  }
  0x34   :  { %790 = vsyncadd [#allocation9], 4294966272  ;;  %v801_v0 = vmov 0   ;;  %v802_v1 = vmov 0.0   ;;  %v861_v2 = vld [vmem:[#allocation2] sm:$0xff]  ;;  %vm172_vm0 = vcmask 64512   ;;  %v79_v44 = vlaneseq }
  0x35   :  { %657 = vset.pattern.permute.xlu1 %v801_v0  ;;  %656 = vset.pattern.permute.xlu0 %v801_v0  ;;  %vm85_vm1 = vcmp.ne.s32.totalorder %v861_v2, 0  ;;  %v803_v6 = vmov 1   ;;  %v804_v7 = vmov 2   ;;  %v805_v8 = vmov 3   ;;  %v195_v10 = vld [vmem:[#allocation5 + $0x78] sm:$0xff]  ;;  %v194_v12 = vld [vmem:[#allocation5 + $0x70] sm:$0xff] }
  0x36   :  { %562 = vmatprep.subr.mxu0 %v802_v1  ;;  %597 = vmatprep.subr.bf16.mxu1 %v802_v1  ;;  %v864_v3 = vsel %vm85_vm1, 1, %v801_v0  ;;  %v171_v4 = vsel %vm85_vm1, 1.0, %v802_v1  ;;  %v806_v9 = vmov 6   ;;  %v807_v11 = vmov 4   ;;  %v193_v14 = vld [vmem:[#allocation5 + $0x68] sm:$0xff]  ;;  %v192_v15 = vld [vmem:[#allocation5 + $0x60] sm:$0xff] }
  0x37   :  { %88 = vperm.xlu1 %657, %v864_v3   ;;  %v173_v5 = vsel %vm172_vm0, %v171_v4, 0.0  ;;  %563 = vmatpush3.msra.mxu0 %v195_v10  ;;  %v808_v13 = vmov 7   ;;  %v191_v16 = vld [vmem:[#allocation5 + $0x58] sm:$0xff]  ;;  %v809_v17 = vmov 5   ;;  %v190_v18 = vld [vmem:[#allocation5 + $0x50] sm:$0xff]  ;;  %v189_v19 = vld [vmem:[#allocation5 + $0x48] sm:$0xff] }
  0x38   :  { %174 = vadd.xlane.f32.xlu0 %v173_v5  ;;  %564 = vmatprep.subr.mxu0 %v802_v1  ;;  %v188_v20 = vld [vmem:[#allocation5 + $0x40] sm:$0xff]  ;;  %v187_v21 = vld [vmem:[#allocation5 + $0x38] sm:$0xff]  ;;  %v186_v22 = vld [vmem:[#allocation5 + $0x30] sm:$0xff]  ;;  %vm810_vm2 = vmmov 0   ;;  %v80_v47 = vand.u32 127, %v79_v44  ;;  %s811_s21 = smov [#allocation10]  }
  0x39   :  { %565 = vmatpush3.msra.mxu0 %v194_v12  ;;  %v185_v23 = vld [vmem:[#allocation5 + $0x28] sm:$0xff]  ;;  %v184_v24 = vld [vmem:[#allocation5 + $0x20] sm:$0xff]  ;;  %v183_v25 = vld [vmem:[#allocation5 + $0x18] sm:$0xff]  ;;  %594 = vmatprep.mubr.msk.f32.mxu0 %vm810_vm2, %v802_v1  ;;  %s498_s22 = sshll.u32 %s811_s21, 4  ;;  %s499_s22 = int_to_ptr.vmem [resolvable:$true] %s498_s22 }
  0x3a   :  { %566 = vmatprep.subr.mxu0 %v802_v1  ;;  %v182_v26 = vld [vmem:[#allocation5 + $0x10] sm:$0xff]  ;;  %v181_v27 = vld [vmem:[#allocation5 + $0x8] sm:$0xff]  ;;  %v180_v28 = vld [vmem:[#allocation5] sm:$0xff]  ;;  %613 = vmatprep.mubr.msk.bf16.mxu1 %vm810_vm2, %v802_v1  ;;  %p770_p7 = scmp.lt.s32.totalorder %s499_s22, %s499_s22 }
  0x3b   :  { %658 = vset.pattern.permute.xlu1 %v803_v6  ;;  %567 = vmatpush3.msra.mxu0 %v193_v14  ;;  %v667_v29 = vld [vmem:[#allocation7 + $0x38] sm:$0xff]   ;;  %v668_v30 = vld [vmem:[#allocation7 + $0x30] sm:$0xff]   ;;  %v669_v31 = vld [vmem:[#allocation7 + $0x28] sm:$0xff]  }
  0x3c   :  { %95 = vperm.xlu1 %658, %v861_v2   ;;  %568 = vmatprep.subr.mxu0 %v802_v1  ;;  %v670_v32 = vld [vmem:[#allocation7 + $0x20] sm:$0xff]   ;;  %v671_v33 = vld [vmem:[#allocation7 + $0x18] sm:$0xff]   ;;  %v672_v34 = vld [vmem:[#allocation7 + $0x10] sm:$0xff]  }
  0x3d   :  { %569 = vmatpush3.msra.mxu0 %v192_v15  ;;  %598 = vmatpush3.bf16.msra.mxu1 %v667_v29  ;;  %v673_v35 = vld [vmem:[#allocation7 + $0x8] sm:$0xff]   ;;  %v674_v10 = vld [vmem:[#allocation7] sm:$0xff]   ;;  %v676_v12 = vld [vmem:[#allocation8 + $0x30] sm:$0xff]  }
  0x3e   :  { %570 = vmatprep.subr.mxu0 %v802_v1  ;;  %599 = vmatprep.subr.bf16.mxu1 %v802_v1  ;;  %v678_v14 = vld [vmem:[#allocation8 + $0x20] sm:$0xff]   ;;  %v679_v15 = vld [vmem:[#allocation8 + $0x18] sm:$0xff]  }
  0x3f   :  { %571 = vmatpush3.msra.mxu0 %v191_v16  ;;  %v680_v16 = vld [vmem:[#allocation8 + $0x10] sm:$0xff]  }
  0x40   :  { %99 = vperm.xlu1 %658, %v864_v3   ;;  %572 = vmatprep.subr.mxu0 %v802_v1 }
  0x41   :  { %573 = vmatpush3.msra.mxu0 %v190_v18  ;;  %600 = vmatpush3.bf16.msra.mxu1 %v668_v30  ;;  %v518_v30 = vld [vmem:[%s941_s5] ss:$0 sm:$0xff] }
  0x42   :  { %574 = vmatprep.subr.mxu0 %v802_v1  ;;  %601 = vmatprep.subr.bf16.mxu1 %v802_v1 }
  0x43   :  { %575 = vmatpush3.msra.mxu0 %v189_v19 }
  0x44   :  { %659 = vset.pattern.permute.xlu1 %v804_v7  ;;  %576 = vmatprep.subr.mxu0 %v802_v1 }
  0x45   :  { %106 = vperm.xlu1 %659, %v861_v2   ;;  %577 = vmatpush3.msra.mxu0 %v188_v20  ;;  %v681_v20 = vld [vmem:[#allocation8 + $0x8] sm:$0xff]  }
  0x46   :  { %578 = vmatprep.subr.mxu0 %v802_v1  ;;  %602 = vmatpush3.bf16.msra.mxu1 %v669_v31 }
  0x47   :  { %579 = vmatpush3.msra.mxu0 %v187_v21  ;;  %603 = vmatprep.subr.bf16.mxu1 %v802_v1  ;;  %v682_v21 = vld [vmem:[#allocation8] sm:$0xff]  }
  0x48   :  { %580 = vmatprep.subr.mxu0 %v802_v1 }
  0x49   :  { %110 = vperm.xlu1 %659, %v864_v3   ;;  %581 = vmatpush3.msra.mxu0 %v186_v22  ;;  %v509_v22 = vld [vmem:[%s939_s3] ss:$0 sm:$0xff]  ;;  %s765_s3 = scalar_lea.vmem %s499_s22, 128 }
  0x4a   :  { %582 = vmatprep.subr.mxu0 %v802_v1  ;;  %604 = vmatpush3.bf16.msra.mxu1 %v670_v32  ;;  %p766_p6 = scmp.ne.s32.totalorder %s499_s22, %s765_s3  ;;  %p771_p8 = scmp.lt.s32.totalorder %s765_s3, %s765_s3 }
  0x4b   :  { %583 = vmatpush3.msra.mxu0 %v185_v23  ;;  %605 = vmatprep.subr.bf16.mxu1 %v802_v1 }
  0x4c   :  { %584 = vmatprep.subr.mxu0 %v802_v1  ;;  %p772_p9 = por %p771_p8, %p770_p7 }
  0x4d   :  { %660 = vset.pattern.permute.xlu1 %v805_v8  ;;  %585 = vmatpush3.msra.mxu0 %v184_v24 }
  0x4e   :  { %82 = vperm.xlu0 %656, %v861_v2   ;;  %117 = vperm.xlu1 %660, %v861_v2   ;;  %p773_p10 = pnand %p772_p9, %p766_p6 }
  0x4f   :  { %586 = vmatprep.subr.mxu0 %v802_v1  ;;  %606 = vmatpush3.bf16.msra.mxu1 %v671_v33 }
  0x50   :  { %587 = vmatpush3.msra.mxu0 %v183_v25  ;;  %607 = vmatprep.subr.bf16.mxu1 %v802_v1 }
  0x51   :  { %588 = vmatprep.subr.mxu0 %v802_v1 }
  0x52   :  { %121 = vperm.xlu1 %660, %v864_v3   ;;  %664 = vset.pattern.permute.xlu0 %v806_v9 }
  0x53   :  { %154 = vperm.xlu0 %664, %v864_v3   ;;  %589 = vmatpush3.msra.mxu0 %v182_v26 }
  0x54   :  { %590 = vmatprep.subr.mxu0 %v802_v1  ;;  %608 = vmatpush3.bf16.msra.mxu1 %v672_v34 }
  0x55   :  { %591 = vmatpush3.msra.mxu0 %v181_v27  ;;  %609 = vmatprep.subr.bf16.mxu1 %v802_v1 }
  0x56   :  { %661 = vset.pattern.permute.xlu1 %v807_v11  ;;  %592 = vmatprep.subr.mxu0 %v802_v1  ;;  %v675_v11 = vld [vmem:[#allocation8 + $0x38] sm:$0xff]  }
  0x57   :  { %128 = vperm.xlu1 %661, %v861_v2   ;;  %666 = vset.pattern.permute.xlu0 %v808_v13 }
  0x58   :  { %593 = vmatpush3.msra.mxu0 %v180_v28  ;;  %610 = vmatpush3.bf16.msra.mxu1 %v673_v35 }
  0x59   :  { %617 = vmatprep.subr.bf16.mxu0 %v802_v1  ;;  %611 = vmatprep.subr.bf16.mxu1 %v802_v1 }
  0x5b   :  { %132 = vperm.xlu1 %661, %v864_v3  }
  0x5c   :  { %612 = vmatpush3.bf16.msra.mxu1 %v674_v10 }
  0x5f   :  { %662 = vset.pattern.permute.xlu1 %v809_v17 }
  0x60   :  { %139 = vperm.xlu1 %662, %v861_v2  }
  0x64   :  { %143 = vperm.xlu1 %662, %v864_v3  }
  0x68   :  { %663 = vset.pattern.permute.xlu1 %v806_v9 }
  0x69   :  { %150 = vperm.xlu1 %663, %v861_v2  }
  0x6d   :  { %665 = vset.pattern.permute.xlu1 %v808_v13  ;;  %v677_v13 = vld [vmem:[#allocation8 + $0x28] sm:$0xff]  }
  0x6e   :  { %161 = vperm.xlu1 %665, %v861_v2  }
  0x72   :  { %165 = vperm.xlu1 %665, %v864_v3  }
  0xb2   :  { %v89_v36 = vpop.permute.xlu1 %88 }
  0xb3   :  { %vm90_vm4 = vcmp.eq.s32.totalorder %v89_v36, 1 }
  0xb7   :  { %v96_v37 = vpop.permute.xlu1 %95 }
  0xb8   :  { %vm97_vm7 = vcmp.eq.s32.totalorder %v80_v47, %v96_v37 }
  0xbb   :  { %v100_v38 = vpop.permute.xlu1 %99 }
  0xbc   :  { %vm101_vm5 = vcmp.eq.s32.totalorder %v100_v38, 1 }
  0xbd   :  { %vm102_vm8 = vmand %vm97_vm7, %vm101_vm5 }
  0xbe   :  { %v103_v52 = vsel %vm102_vm8, 1.0, %v802_v1 }
  0xc0   :  { %v107_v39 = vpop.permute.xlu1 %106 }
  0xc1   :  { %v175_v43 = vpop.xlane.xlu0 %174  ;;  %vm108_vm10 = vcmp.eq.s32.totalorder %v80_v47, %v107_v39 }
  0xc2   :  { %v176_v53 = vmax.f32 %v175_v43, 1.0 }
  0xc4   :  { %v111_v40 = vpop.permute.xlu1 %110  ;;  %683 = vrcp.f32 %v176_v53 }
  0xc5   :  { %vm112_vm9 = vcmp.eq.s32.totalorder %v111_v40, 1 }
  0xc6   :  { %vm113_vm12 = vmand %vm108_vm10, %vm112_vm9 }
  0xc7   :  { %v114_v56 = vsel %vm113_vm12, 1.0, %v802_v1 }
  0xc9   :  { %v118_v41 = vpop.permute.xlu1 %117  ;;  %v83_v46 = vpop.permute.xlu0 %82 }
  0xca   :  { %vm84_vm3 = vcmp.eq.s32.totalorder %v80_v47, %v83_v46  ;;  %vm119_vm13 = vcmp.eq.s32.totalorder %v80_v47, %v118_v41 }
  0xcb   :  { %vm91_vm6 = vmand %vm84_vm3, %vm90_vm4 }
  0xcc   :  { %v92_v50 = vsel %vm91_vm6, 1.0, %v802_v1 }
  0xcd   :  { %v122_v42 = vpop.permute.xlu1 %121  ;;  %v104_v54 = vadd.f32 %v103_v52, %v92_v50 }
  0xce   :  { %vm123_vm11 = vcmp.eq.s32.totalorder %v122_v42, 1  ;;  %v155_v55 = vpop.permute.xlu0 %154 }
  0xcf   :  { %vm124_vm15 = vmand %vm119_vm13, %vm123_vm11  ;;  %v115_v58 = vadd.f32 %v114_v56, %v104_v54  ;;  %vm156_vm5 = vcmp.eq.s32.totalorder %v155_v55, 1 }
  0xd0   :  { %v125_v59 = vsel %vm124_vm15, 1.0, %v802_v1 }
  0xd1   :  { %v126_v61 = vadd.f32 %v125_v59, %v115_v58  ;;  %v684_v8 = vpop.eup %683 }
  0xd2   :  { %v129_v45 = vpop.permute.xlu1 %128 }
  0xd3   :  { %vm130_vm0 = vcmp.eq.s32.totalorder %v80_v47, %v129_v45 }
  0xd6   :  { %v133_v48 = vpop.permute.xlu1 %132 }
  0xd7   :  { %vm134_vm14 = vcmp.eq.s32.totalorder %v133_v48, 1 }
  0xd8   :  { %vm135_vm3 = vmand %vm130_vm0, %vm134_vm14 }
  0xd9   :  { %v136_v60 = vsel %vm135_vm3, 1.0, %v802_v1 }
  0xda   :  { %v137_v0 = vadd.f32 %v136_v60, %v126_v61 }
  0xdb   :  { %v140_v49 = vpop.permute.xlu1 %139 }
  0xdc   :  { %vm141_vm4 = vcmp.eq.s32.totalorder %v80_v47, %v140_v49 }
  0xdf   :  { %v144_v51 = vpop.permute.xlu1 %143 }
  0xe0   :  { %vm145_vm1 = vcmp.eq.s32.totalorder %v144_v51, 1 }
  0xe1   :  { %vm146_vm7 = vmand %vm141_vm4, %vm145_vm1 }
  0xe2   :  { %v147_v63 = vsel %vm146_vm7, 1.0, %v802_v1 }
  0xe3   :  { %v148_v3 = vadd.f32 %v147_v63, %v137_v0 }
  0xe4   :  { %v151_v57 = vpop.permute.xlu1 %150 }
  0xe5   :  { %vm152_vm6 = vcmp.eq.s32.totalorder %v80_v47, %v151_v57 }
  0xe6   :  { %vm157_vm8 = vmand %vm152_vm6, %vm156_vm5 }
  0xe7   :  { %v158_v2 = vsel %vm157_vm8, 1.0, %v802_v1 }
  0xe8   :  { %v159_v5 = vadd.f32 %v158_v2, %v148_v3 }
  0xe9   :  { %v162_v62 = vpop.permute.xlu1 %161 }
  0xea   :  { %vm163_vm9 = vcmp.eq.s32.totalorder %v80_v47, %v162_v62 }
  0xed   :  { %v166_v4 = vpop.permute.xlu1 %165 }
  0xee   :  { %vm167_vm10 = vcmp.eq.s32.totalorder %v166_v4, 1 }
  0xef   :  { %vm168_vm11 = vmand %vm163_vm9, %vm167_vm10 }
  0xf0   :  { %v169_v6 = vsel %vm168_vm11, 1.0, %v802_v1 }
  0xf1   :  { %v170_v7 = vadd.f32 %v169_v6, %v159_v5 }
  0xf3   :  { %v179_v9 = vmul.f32 %v684_v8, %v170_v7 }
  0xf5   :  { %595 = vmatmul.mubr.f32.vlgmr.msra.gmra.mxu0 %v179_v9 }
  0xf6   :  { %633 = vmatprep.mubr.msk.bf16.mxu0 %vm810_vm2, %v802_v1  ;;  %618 = vmatpush3.bf16.msra.mxu0 %v675_v11 }
  0xf7   :  { %619 = vmatprep.subr.bf16.mxu0 %v802_v1 }
  0xfa   :  { %620 = vmatpush3.bf16.msra.mxu0 %v676_v12 }
  0xfb   :  { %621 = vmatprep.subr.bf16.mxu0 %v802_v1 }
  0xfe   :  { %622 = vmatpush3.bf16.msra.mxu0 %v677_v13 }
  0xff   :  { %623 = vmatprep.subr.bf16.mxu0 %v802_v1 }
 0x102   :  { %624 = vmatpush3.bf16.msra.mxu0 %v678_v14 }
 0x103   :  { %625 = vmatprep.subr.bf16.mxu0 %v802_v1 }
 0x106   :  { %626 = vmatpush3.bf16.msra.mxu0 %v679_v15 }
 0x107   :  { %627 = vmatprep.subr.bf16.mxu0 %v802_v1 }
 0x10a   :  { %628 = vmatpush3.bf16.msra.mxu0 %v680_v16 }
 0x10b   :  { %629 = vmatprep.subr.bf16.mxu0 %v802_v1 }
 0x10e   :  { %630 = vmatpush3.bf16.msra.mxu0 %v681_v20 }
 0x10f   :  { %631 = vmatprep.subr.bf16.mxu0 %v802_v1 }
 0x112   :  { %632 = vmatpush3.bf16.msra.mxu0 %v682_v21 }
 0x1b5   :  { %v262_v17 = vpop.f32.mrf.mxu0 }
 0x1b6   :  { %v266_v18 = vpack.c.bf16 %v262_v17, %v262_v17 }
 0x1b7   :  { %v596_v19 = vpop.f32.mrf.mxu0 }
 0x1b8   :  { %614 = vmatmul.mubr.bf16.vlgmr.msra.gmra.mxu1 %v266_v18 }
 0x278   :  { %v372_v23 = vpop.f32.mrf.mxu1 }
 0x279   :  { %v373_v24 = vadd.f32 %v509_v22, %v372_v23 }
 0x27a   :  { %v615_v25 = vpop.f32.mrf.mxu1 }
 0x27b   :  { %v378_v26 = vmax.f32 %v373_v24, 0.0 }
 0x27c   :  { %v375_v27 = vpop.f32.mrf.mxu1 }
 0x27d   :  { %v379_v28 = vpack.c.bf16 %v378_v26, %v378_v26 }
 0x27e   :  { %v616_v29 = vpop.f32.mrf.mxu1 }
 0x27f   :  { %634 = vmatmul.mubr.bf16.vlgmr.msra.gmra.mxu0 %v379_v28 }
 0x33f   :  { %v485_v1 = vpop.f32.mrf.mxu0 }
 0x340   :  { %v486_v31 = vadd.f32 %v518_v30, %v485_v1 }
 0x341   :  { %v635_v32 = vpop.f32.mrf.mxu0 }
 0x342   :  { %491 = vst [vmem:[#allocation10] sm:$0xff] %v486_v31 }
 0x343   :  { %v488_v33 = vpop.f32.mrf.mxu0 }
 0x344   :  { %776 = shalt.err (!%p773_p10)
}
 0x345   :  { %501 = dma.vmem_to_hbm [thread:$0]  %s499_s22, 128, %s942_s6, [#allocation4]   ;;  %v636_v34 = vpop.f32.mrf.mxu0 }
 0x346   :  { %791 = dma.done.wait [#allocation4], 128  }
 0x347   :  { %792 = vsyncadd [#allocation4], 4294967168 }
 0x348   :  { %505 = vsyncpa [#allocation3], 1 }
 0x349   :  { %506 = vsyncpa [#allocation6], 1 }
 0x34a   :  { %507 = vsyncpa [#allocation9], 1 }
 0x34b   :  { %508 = vsyncpa [#allocation4], 1 }

</bundles_post_ra>
